<compile_context>
chip_gen: v6e
topology: v6e:2x2x1
jax: 0.10.0
libtpu: 0.0.40
codegen_flags: <defaults>
</compile_context>

<pallas_src>
from functools import partial

import jax
import jax.numpy as jnp
from jax.experimental import pallas as pl
from jax.experimental.pallas import tpu as pltpu

LANES = 128     # lane width of a vreg
CHUNK = 8       # sublane rows processed per inner iteration (1 vreg of input)


def mlp_kernel(x_ref, w1_ref, b1_ref, w2_ref, b2_ref, w3_ref, b3_ref, o_ref,
               *, hidden: int, chunk: int):
    h = hidden
    n_chunks = x_ref.shape[0] // chunk

    # Hoist all scalar weight reads (SMEM -> sregs) out of the row loop.
    w1 = [w1_ref[j] for j in range(h)]
    b1 = [b1_ref[j] for j in range(h)]
    w2 = [[w2_ref[j * h + k] for k in range(h)] for j in range(h)]
    b2 = [b2_ref[k] for k in range(h)]
    w3 = [w3_ref[k] for k in range(h)]
    b3 = b3_ref[0]

    @pl.loop(0, n_chunks)
    def _(c):
        r = pl.multiple_of(c * chunk, chunk)
        x = x_ref[pl.ds(r, chunk), :]                       # [chunk, 128] f32

        # Layer 1: Linear(1, h) + ReLU == per-channel scale + shift (VPU).
        h1 = [jnp.maximum(x * w1[j] + b1[j], 0.0) for j in range(h)]

        # Layer 2: Linear(h, h) + ReLU == h-term broadcast MAC per channel.
        h2 = []
        for k in range(h):
            acc = h1[0] * w2[0][k] + b2[k]
            for j in range(1, h):
                acc = acc + h1[j] * w2[j][k]
            h2.append(jnp.maximum(acc, 0.0))

        # Layer 3: Linear(h, 1) == h-term weighted sum.
        out = h2[0] * w3[0] + b3
        for k in range(1, h):
            out = out + h2[k] * w3[k]

        o_ref[pl.ds(r, chunk), :] = out                     # full-lane store


def simple_net_forward(x, params, *, block_rows=512):
    """x: [N, 1] float32.  params: dict of (w1,b1,w2,b2,w3,b3), weights [in,out]."""
    n = x.shape[0]
    h = params["w1"].shape[-1]

    # --- lane-dense layout: batch along the 128-lane axis ------------------
    rows = max(CHUNK, pl.cdiv(n, LANES))
    rows = ((rows + CHUNK - 1) // CHUNK) * CHUNK            # multiple of 8 sublanes
    br = min(block_rows, rows)                              # rows per grid block
    rows = ((rows + br - 1) // br) * br                     # divisible by block
    n_pad = rows * LANES

    xf = jnp.pad(x.reshape(-1).astype(jnp.float32), (0, n_pad - n))
    x2 = xf.reshape(rows, LANES)

    # --- tiny weights: flatten to 1-D and keep them in SMEM ----------------
    w1 = params["w1"].reshape(-1).astype(jnp.float32)       # [h]
    b1 = params["b1"].reshape(-1).astype(jnp.float32)       # [h]
    w2 = params["w2"].reshape(-1).astype(jnp.float32)       # [h*h] row-major [in,out]
    b2 = params["b2"].reshape(-1).astype(jnp.float32)       # [h]
    w3 = params["w3"].reshape(-1).astype(jnp.float32)       # [h]
    b3 = params["b3"].reshape(-1).astype(jnp.float32)       # [1]

    smem = pl.BlockSpec(memory_space=pltpu.MemorySpace.SMEM)
    grid = (rows // br,)

    out2d = pl.pallas_call(
        partial(mlp_kernel, hidden=h, chunk=CHUNK),
        out_shape=jax.ShapeDtypeStruct((rows, LANES), jnp.float32),
        grid=grid,
        in_specs=[
            pl.BlockSpec((br, LANES), lambda i: (i, 0)),    # x tile (lane-dense)
            smem, smem, smem, smem, smem, smem,             # weights / biases
        ],
        out_specs=pl.BlockSpec((br, LANES), lambda i: (i, 0)),
        compiler_params=pltpu.CompilerParams(
            dimension_semantics=("parallel",),              # megacore-shardable
            vmem_limit_bytes=32 * 1024 * 1024,              # explicit budget (v7x-safe)
        ),
    )(x2, w1, b1, w2, b2, w3, b3)

    return out2d.reshape(-1)[:n].reshape(n, 1)


def init_params(key, size=8):
    """Deterministic init mimicking nn.Linear's U(-1/sqrt(fan_in), 1/sqrt(fan_in))."""
    ks = jax.random.split(key, 6)

    def linear(kw, kb, fan_in, fan_out):
        bound = 1.0 / jnp.sqrt(jnp.float32(fan_in))
        w = jax.random.uniform(kw, (fan_in, fan_out), jnp.float32, -bound, bound)
        b = jax.random.uniform(kb, (1, fan_out), jnp.float32, -bound, bound)
        return w, b

    w1, b1 = linear(ks[0], ks[1], 1, size)
    w2, b2 = linear(ks[2], ks[3], size, size)
    w3, b3 = linear(ks[4], ks[5], size, 1)
    return {"w1": w1, "b1": b1, "w2": w2, "b2": b2, "w3": w3, "b3": b3}


def reference_forward(x, p):
    h1 = jnp.maximum(x @ p["w1"] + p["b1"], 0.0)
    h2 = jnp.maximum(h1 @ p["w2"] + p["b2"], 0.0)
    return h2 @ p["w3"] + p["b3"]


if __name__ == "__main__":
    key = jax.random.PRNGKey(0)
    k_x, k_p = jax.random.split(key)

    size = 8
    batch = 300   # non-multiple of 128: exercises lane-dense padding + slicing
    x = jax.random.normal(k_x, (batch, 1), dtype=jnp.float32)
    params = init_params(k_p, size=size)

    out = simple_net_forward(x, params)
    out = jax.block_until_ready(out)

    ref = reference_forward(x, params)
    assert out.shape == (batch, 1)
    assert jnp.allclose(out, ref, atol=1e-5, rtol=1e-5)

    print("KERNEL_OK")
</pallas_src>

<mosaic_0001>
module attributes {stable_mosaic.version = 11 : i64} {
  func.func @mlp_kernel(%arg0: i32, %arg1: memref<8x128xf32, #tpu.memory_space<vmem>>, %arg2: memref<8xf32, #tpu.memory_space<smem>>, %arg3: memref<8xf32, #tpu.memory_space<smem>>, %arg4: memref<64xf32, #tpu.memory_space<smem>>, %arg5: memref<8xf32, #tpu.memory_space<smem>>, %arg6: memref<8xf32, #tpu.memory_space<smem>>, %arg7: memref<1xf32, #tpu.memory_space<smem>>, %arg8: memref<8x128xf32, #tpu.memory_space<vmem>>) attributes {dimension_semantics = [#tpu.dimension_semantics<parallel>], iteration_bounds = array<i64: 1>, scalar_prefetch = 0 : i64, scratch_operands = 0 : i64, tpu.core_type = #tpu.core_type<tc>, window_params = [{transform_indices = @transform_0, window_bounds = array<i64: 8, 128>}, {transform_indices = @transform_1, window_bounds = array<i64: 8>}, {transform_indices = @transform_2, window_bounds = array<i64: 8>}, {transform_indices = @transform_3, window_bounds = array<i64: 64>}, {transform_indices = @transform_4, window_bounds = array<i64: 8>}, {transform_indices = @transform_5, window_bounds = array<i64: 8>}, {transform_indices = @transform_6, window_bounds = array<i64: 1>}, {transform_indices = @transform_7, window_bounds = array<i64: 8, 128>}]} {
    %c0 = arith.constant 0 : index
    %0 = memref.load %arg2[%c0] : memref<8xf32, #tpu.memory_space<smem>>
    %c1 = arith.constant 1 : index
    %1 = memref.load %arg2[%c1] : memref<8xf32, #tpu.memory_space<smem>>
    %c2 = arith.constant 2 : index
    %2 = memref.load %arg2[%c2] : memref<8xf32, #tpu.memory_space<smem>>
    %c3 = arith.constant 3 : index
    %3 = memref.load %arg2[%c3] : memref<8xf32, #tpu.memory_space<smem>>
    %c4 = arith.constant 4 : index
    %4 = memref.load %arg2[%c4] : memref<8xf32, #tpu.memory_space<smem>>
    %c5 = arith.constant 5 : index
    %5 = memref.load %arg2[%c5] : memref<8xf32, #tpu.memory_space<smem>>
    %c6 = arith.constant 6 : index
    %6 = memref.load %arg2[%c6] : memref<8xf32, #tpu.memory_space<smem>>
    %c7 = arith.constant 7 : index
    %7 = memref.load %arg2[%c7] : memref<8xf32, #tpu.memory_space<smem>>
    %c0_0 = arith.constant 0 : index
    %8 = memref.load %arg3[%c0_0] : memref<8xf32, #tpu.memory_space<smem>>
    %c1_1 = arith.constant 1 : index
    %9 = memref.load %arg3[%c1_1] : memref<8xf32, #tpu.memory_space<smem>>
    %c2_2 = arith.constant 2 : index
    %10 = memref.load %arg3[%c2_2] : memref<8xf32, #tpu.memory_space<smem>>
    %c3_3 = arith.constant 3 : index
    %11 = memref.load %arg3[%c3_3] : memref<8xf32, #tpu.memory_space<smem>>
    %c4_4 = arith.constant 4 : index
    %12 = memref.load %arg3[%c4_4] : memref<8xf32, #tpu.memory_space<smem>>
    %c5_5 = arith.constant 5 : index
    %13 = memref.load %arg3[%c5_5] : memref<8xf32, #tpu.memory_space<smem>>
    %c6_6 = arith.constant 6 : index
    %14 = memref.load %arg3[%c6_6] : memref<8xf32, #tpu.memory_space<smem>>
    %c7_7 = arith.constant 7 : index
    %15 = memref.load %arg3[%c7_7] : memref<8xf32, #tpu.memory_space<smem>>
    %c0_8 = arith.constant 0 : index
    %16 = memref.load %arg4[%c0_8] : memref<64xf32, #tpu.memory_space<smem>>
    %c1_9 = arith.constant 1 : index
    %17 = memref.load %arg4[%c1_9] : memref<64xf32, #tpu.memory_space<smem>>
    %c2_10 = arith.constant 2 : index
    %18 = memref.load %arg4[%c2_10] : memref<64xf32, #tpu.memory_space<smem>>
    %c3_11 = arith.constant 3 : index
    %19 = memref.load %arg4[%c3_11] : memref<64xf32, #tpu.memory_space<smem>>
    %c4_12 = arith.constant 4 : index
    %20 = memref.load %arg4[%c4_12] : memref<64xf32, #tpu.memory_space<smem>>
    %c5_13 = arith.constant 5 : index
    %21 = memref.load %arg4[%c5_13] : memref<64xf32, #tpu.memory_space<smem>>
    %c6_14 = arith.constant 6 : index
    %22 = memref.load %arg4[%c6_14] : memref<64xf32, #tpu.memory_space<smem>>
    %c7_15 = arith.constant 7 : index
    %23 = memref.load %arg4[%c7_15] : memref<64xf32, #tpu.memory_space<smem>>
    %c8 = arith.constant 8 : index
    %24 = memref.load %arg4[%c8] : memref<64xf32, #tpu.memory_space<smem>>
    %c9 = arith.constant 9 : index
    %25 = memref.load %arg4[%c9] : memref<64xf32, #tpu.memory_space<smem>>
    %c10 = arith.constant 10 : index
    %26 = memref.load %arg4[%c10] : memref<64xf32, #tpu.memory_space<smem>>
    %c11 = arith.constant 11 : index
    %27 = memref.load %arg4[%c11] : memref<64xf32, #tpu.memory_space<smem>>
    %c12 = arith.constant 12 : index
    %28 = memref.load %arg4[%c12] : memref<64xf32, #tpu.memory_space<smem>>
    %c13 = arith.constant 13 : index
    %29 = memref.load %arg4[%c13] : memref<64xf32, #tpu.memory_space<smem>>
    %c14 = arith.constant 14 : index
    %30 = memref.load %arg4[%c14] : memref<64xf32, #tpu.memory_space<smem>>
    %c15 = arith.constant 15 : index
    %31 = memref.load %arg4[%c15] : memref<64xf32, #tpu.memory_space<smem>>
    %c16 = arith.constant 16 : index
    %32 = memref.load %arg4[%c16] : memref<64xf32, #tpu.memory_space<smem>>
    %c17 = arith.constant 17 : index
    %33 = memref.load %arg4[%c17] : memref<64xf32, #tpu.memory_space<smem>>
    %c18 = arith.constant 18 : index
    %34 = memref.load %arg4[%c18] : memref<64xf32, #tpu.memory_space<smem>>
    %c19 = arith.constant 19 : index
    %35 = memref.load %arg4[%c19] : memref<64xf32, #tpu.memory_space<smem>>
    %c20 = arith.constant 20 : index
    %36 = memref.load %arg4[%c20] : memref<64xf32, #tpu.memory_space<smem>>
    %c21 = arith.constant 21 : index
    %37 = memref.load %arg4[%c21] : memref<64xf32, #tpu.memory_space<smem>>
    %c22 = arith.constant 22 : index
    %38 = memref.load %arg4[%c22] : memref<64xf32, #tpu.memory_space<smem>>
    %c23 = arith.constant 23 : index
    %39 = memref.load %arg4[%c23] : memref<64xf32, #tpu.memory_space<smem>>
    %c24 = arith.constant 24 : index
    %40 = memref.load %arg4[%c24] : memref<64xf32, #tpu.memory_space<smem>>
    %c25 = arith.constant 25 : index
    %41 = memref.load %arg4[%c25] : memref<64xf32, #tpu.memory_space<smem>>
    %c26 = arith.constant 26 : index
    %42 = memref.load %arg4[%c26] : memref<64xf32, #tpu.memory_space<smem>>
    %c27 = arith.constant 27 : index
    %43 = memref.load %arg4[%c27] : memref<64xf32, #tpu.memory_space<smem>>
    %c28 = arith.constant 28 : index
    %44 = memref.load %arg4[%c28] : memref<64xf32, #tpu.memory_space<smem>>
    %c29 = arith.constant 29 : index
    %45 = memref.load %arg4[%c29] : memref<64xf32, #tpu.memory_space<smem>>
    %c30 = arith.constant 30 : index
    %46 = memref.load %arg4[%c30] : memref<64xf32, #tpu.memory_space<smem>>
    %c31 = arith.constant 31 : index
    %47 = memref.load %arg4[%c31] : memref<64xf32, #tpu.memory_space<smem>>
    %c32 = arith.constant 32 : index
    %48 = memref.load %arg4[%c32] : memref<64xf32, #tpu.memory_space<smem>>
    %c33 = arith.constant 33 : index
    %49 = memref.load %arg4[%c33] : memref<64xf32, #tpu.memory_space<smem>>
    %c34 = arith.constant 34 : index
    %50 = memref.load %arg4[%c34] : memref<64xf32, #tpu.memory_space<smem>>
    %c35 = arith.constant 35 : index
    %51 = memref.load %arg4[%c35] : memref<64xf32, #tpu.memory_space<smem>>
    %c36 = arith.constant 36 : index
    %52 = memref.load %arg4[%c36] : memref<64xf32, #tpu.memory_space<smem>>
    %c37 = arith.constant 37 : index
    %53 = memref.load %arg4[%c37] : memref<64xf32, #tpu.memory_space<smem>>
    %c38 = arith.constant 38 : index
    %54 = memref.load %arg4[%c38] : memref<64xf32, #tpu.memory_space<smem>>
    %c39 = arith.constant 39 : index
    %55 = memref.load %arg4[%c39] : memref<64xf32, #tpu.memory_space<smem>>
    %c40 = arith.constant 40 : index
    %56 = memref.load %arg4[%c40] : memref<64xf32, #tpu.memory_space<smem>>
    %c41 = arith.constant 41 : index
    %57 = memref.load %arg4[%c41] : memref<64xf32, #tpu.memory_space<smem>>
    %c42 = arith.constant 42 : index
    %58 = memref.load %arg4[%c42] : memref<64xf32, #tpu.memory_space<smem>>
    %c43 = arith.constant 43 : index
    %59 = memref.load %arg4[%c43] : memref<64xf32, #tpu.memory_space<smem>>
    %c44 = arith.constant 44 : index
    %60 = memref.load %arg4[%c44] : memref<64xf32, #tpu.memory_space<smem>>
    %c45 = arith.constant 45 : index
    %61 = memref.load %arg4[%c45] : memref<64xf32, #tpu.memory_space<smem>>
    %c46 = arith.constant 46 : index
    %62 = memref.load %arg4[%c46] : memref<64xf32, #tpu.memory_space<smem>>
    %c47 = arith.constant 47 : index
    %63 = memref.load %arg4[%c47] : memref<64xf32, #tpu.memory_space<smem>>
    %c48 = arith.constant 48 : index
    %64 = memref.load %arg4[%c48] : memref<64xf32, #tpu.memory_space<smem>>
    %c49 = arith.constant 49 : index
    %65 = memref.load %arg4[%c49] : memref<64xf32, #tpu.memory_space<smem>>
    %c50 = arith.constant 50 : index
    %66 = memref.load %arg4[%c50] : memref<64xf32, #tpu.memory_space<smem>>
    %c51 = arith.constant 51 : index
    %67 = memref.load %arg4[%c51] : memref<64xf32, #tpu.memory_space<smem>>
    %c52 = arith.constant 52 : index
    %68 = memref.load %arg4[%c52] : memref<64xf32, #tpu.memory_space<smem>>
    %c53 = arith.constant 53 : index
    %69 = memref.load %arg4[%c53] : memref<64xf32, #tpu.memory_space<smem>>
    %c54 = arith.constant 54 : index
    %70 = memref.load %arg4[%c54] : memref<64xf32, #tpu.memory_space<smem>>
    %c55 = arith.constant 55 : index
    %71 = memref.load %arg4[%c55] : memref<64xf32, #tpu.memory_space<smem>>
    %c56 = arith.constant 56 : index
    %72 = memref.load %arg4[%c56] : memref<64xf32, #tpu.memory_space<smem>>
    %c57 = arith.constant 57 : index
    %73 = memref.load %arg4[%c57] : memref<64xf32, #tpu.memory_space<smem>>
    %c58 = arith.constant 58 : index
    %74 = memref.load %arg4[%c58] : memref<64xf32, #tpu.memory_space<smem>>
    %c59 = arith.constant 59 : index
    %75 = memref.load %arg4[%c59] : memref<64xf32, #tpu.memory_space<smem>>
    %c60 = arith.constant 60 : index
    %76 = memref.load %arg4[%c60] : memref<64xf32, #tpu.memory_space<smem>>
    %c61 = arith.constant 61 : index
    %77 = memref.load %arg4[%c61] : memref<64xf32, #tpu.memory_space<smem>>
    %c62 = arith.constant 62 : index
    %78 = memref.load %arg4[%c62] : memref<64xf32, #tpu.memory_space<smem>>
    %c63 = arith.constant 63 : index
    %79 = memref.load %arg4[%c63] : memref<64xf32, #tpu.memory_space<smem>>
    %c0_16 = arith.constant 0 : index
    %80 = memref.load %arg5[%c0_16] : memref<8xf32, #tpu.memory_space<smem>>
    %c1_17 = arith.constant 1 : index
    %81 = memref.load %arg5[%c1_17] : memref<8xf32, #tpu.memory_space<smem>>
    %c2_18 = arith.constant 2 : index
    %82 = memref.load %arg5[%c2_18] : memref<8xf32, #tpu.memory_space<smem>>
    %c3_19 = arith.constant 3 : index
    %83 = memref.load %arg5[%c3_19] : memref<8xf32, #tpu.memory_space<smem>>
    %c4_20 = arith.constant 4 : index
    %84 = memref.load %arg5[%c4_20] : memref<8xf32, #tpu.memory_space<smem>>
    %c5_21 = arith.constant 5 : index
    %85 = memref.load %arg5[%c5_21] : memref<8xf32, #tpu.memory_space<smem>>
    %c6_22 = arith.constant 6 : index
    %86 = memref.load %arg5[%c6_22] : memref<8xf32, #tpu.memory_space<smem>>
    %c7_23 = arith.constant 7 : index
    %87 = memref.load %arg5[%c7_23] : memref<8xf32, #tpu.memory_space<smem>>
    %c0_24 = arith.constant 0 : index
    %88 = memref.load %arg6[%c0_24] : memref<8xf32, #tpu.memory_space<smem>>
    %c1_25 = arith.constant 1 : index
    %89 = memref.load %arg6[%c1_25] : memref<8xf32, #tpu.memory_space<smem>>
    %c2_26 = arith.constant 2 : index
    %90 = memref.load %arg6[%c2_26] : memref<8xf32, #tpu.memory_space<smem>>
    %c3_27 = arith.constant 3 : index
    %91 = memref.load %arg6[%c3_27] : memref<8xf32, #tpu.memory_space<smem>>
    %c4_28 = arith.constant 4 : index
    %92 = memref.load %arg6[%c4_28] : memref<8xf32, #tpu.memory_space<smem>>
    %c5_29 = arith.constant 5 : index
    %93 = memref.load %arg6[%c5_29] : memref<8xf32, #tpu.memory_space<smem>>
    %c6_30 = arith.constant 6 : index
    %94 = memref.load %arg6[%c6_30] : memref<8xf32, #tpu.memory_space<smem>>
    %c7_31 = arith.constant 7 : index
    %95 = memref.load %arg6[%c7_31] : memref<8xf32, #tpu.memory_space<smem>>
    %c0_32 = arith.constant 0 : index
    %96 = memref.load %arg7[%c0_32] : memref<1xf32, #tpu.memory_space<smem>>
    %c0_i32 = arith.constant 0 : i32
    %c1_i32 = arith.constant 1 : i32
    %97 = arith.muli %c0_i32, %c1_i32 : i32
    %c0_i32_33 = arith.constant 0 : i32
    %98 = arith.addi %c0_i32_33, %97 : i32
    %c8_i32 = arith.constant 8 : i32
    %99 = arith.muli %98, %c8_i32 : i32
    %100 = tpu.assume_multiple %99, 8 : i32
    %101 = arith.index_cast %100 : i32 to index
    %c0_34 = arith.constant 0 : index
    %102 = vector.load %arg1[%101, %c0_34] : memref<8x128xf32, #tpu.memory_space<vmem>>, vector<8x128xf32>
    %103 = vector.broadcast %0 : f32 to vector<8x128xf32>
    %104 = arith.mulf %102, %103 : vector<8x128xf32>
    %105 = vector.broadcast %8 : f32 to vector<8x128xf32>
    %106 = arith.addf %104, %105 : vector<8x128xf32>
    %cst = arith.constant 0.000000e+00 : f32
    %107 = vector.broadcast %cst : f32 to vector<8x128xf32>
    %108 = arith.maximumf %106, %107 : vector<8x128xf32>
    %109 = vector.broadcast %1 : f32 to vector<8x128xf32>
    %110 = arith.mulf %102, %109 : vector<8x128xf32>
    %111 = vector.broadcast %9 : f32 to vector<8x128xf32>
    %112 = arith.addf %110, %111 : vector<8x128xf32>
    %cst_35 = arith.constant 0.000000e+00 : f32
    %113 = vector.broadcast %cst_35 : f32 to vector<8x128xf32>
    %114 = arith.maximumf %112, %113 : vector<8x128xf32>
    %115 = vector.broadcast %2 : f32 to vector<8x128xf32>
    %116 = arith.mulf %102, %115 : vector<8x128xf32>
    %117 = vector.broadcast %10 : f32 to vector<8x128xf32>
    %118 = arith.addf %116, %117 : vector<8x128xf32>
    %cst_36 = arith.constant 0.000000e+00 : f32
    %119 = vector.broadcast %cst_36 : f32 to vector<8x128xf32>
    %120 = arith.maximumf %118, %119 : vector<8x128xf32>
    %121 = vector.broadcast %3 : f32 to vector<8x128xf32>
    %122 = arith.mulf %102, %121 : vector<8x128xf32>
    %123 = vector.broadcast %11 : f32 to vector<8x128xf32>
    %124 = arith.addf %122, %123 : vector<8x128xf32>
    %cst_37 = arith.constant 0.000000e+00 : f32
    %125 = vector.broadcast %cst_37 : f32 to vector<8x128xf32>
    %126 = arith.maximumf %124, %125 : vector<8x128xf32>
    %127 = vector.broadcast %4 : f32 to vector<8x128xf32>
    %128 = arith.mulf %102, %127 : vector<8x128xf32>
    %129 = vector.broadcast %12 : f32 to vector<8x128xf32>
    %130 = arith.addf %128, %129 : vector<8x128xf32>
    %cst_38 = arith.constant 0.000000e+00 : f32
    %131 = vector.broadcast %cst_38 : f32 to vector<8x128xf32>
    %132 = arith.maximumf %130, %131 : vector<8x128xf32>
    %133 = vector.broadcast %5 : f32 to vector<8x128xf32>
    %134 = arith.mulf %102, %133 : vector<8x128xf32>
    %135 = vector.broadcast %13 : f32 to vector<8x128xf32>
    %136 = arith.addf %134, %135 : vector<8x128xf32>
    %cst_39 = arith.constant 0.000000e+00 : f32
    %137 = vector.broadcast %cst_39 : f32 to vector<8x128xf32>
    %138 = arith.maximumf %136, %137 : vector<8x128xf32>
    %139 = vector.broadcast %6 : f32 to vector<8x128xf32>
    %140 = arith.mulf %102, %139 : vector<8x128xf32>
    %141 = vector.broadcast %14 : f32 to vector<8x128xf32>
    %142 = arith.addf %140, %141 : vector<8x128xf32>
    %cst_40 = arith.constant 0.000000e+00 : f32
    %143 = vector.broadcast %cst_40 : f32 to vector<8x128xf32>
    %144 = arith.maximumf %142, %143 : vector<8x128xf32>
    %145 = vector.broadcast %7 : f32 to vector<8x128xf32>
    %146 = arith.mulf %102, %145 : vector<8x128xf32>
    %147 = vector.broadcast %15 : f32 to vector<8x128xf32>
    %148 = arith.addf %146, %147 : vector<8x128xf32>
    %cst_41 = arith.constant 0.000000e+00 : f32
    %149 = vector.broadcast %cst_41 : f32 to vector<8x128xf32>
    %150 = arith.maximumf %148, %149 : vector<8x128xf32>
    %151 = vector.broadcast %16 : f32 to vector<8x128xf32>
    %152 = arith.mulf %108, %151 : vector<8x128xf32>
    %153 = vector.broadcast %80 : f32 to vector<8x128xf32>
    %154 = arith.addf %152, %153 : vector<8x128xf32>
    %155 = vector.broadcast %24 : f32 to vector<8x128xf32>
    %156 = arith.mulf %114, %155 : vector<8x128xf32>
    %157 = arith.addf %154, %156 : vector<8x128xf32>
    %158 = vector.broadcast %32 : f32 to vector<8x128xf32>
    %159 = arith.mulf %120, %158 : vector<8x128xf32>
    %160 = arith.addf %157, %159 : vector<8x128xf32>
    %161 = vector.broadcast %40 : f32 to vector<8x128xf32>
    %162 = arith.mulf %126, %161 : vector<8x128xf32>
    %163 = arith.addf %160, %162 : vector<8x128xf32>
    %164 = vector.broadcast %48 : f32 to vector<8x128xf32>
    %165 = arith.mulf %132, %164 : vector<8x128xf32>
    %166 = arith.addf %163, %165 : vector<8x128xf32>
    %167 = vector.broadcast %56 : f32 to vector<8x128xf32>
    %168 = arith.mulf %138, %167 : vector<8x128xf32>
    %169 = arith.addf %166, %168 : vector<8x128xf32>
    %170 = vector.broadcast %64 : f32 to vector<8x128xf32>
    %171 = arith.mulf %144, %170 : vector<8x128xf32>
    %172 = arith.addf %169, %171 : vector<8x128xf32>
    %173 = vector.broadcast %72 : f32 to vector<8x128xf32>
    %174 = arith.mulf %150, %173 : vector<8x128xf32>
    %175 = arith.addf %172, %174 : vector<8x128xf32>
    %cst_42 = arith.constant 0.000000e+00 : f32
    %176 = vector.broadcast %cst_42 : f32 to vector<8x128xf32>
    %177 = arith.maximumf %175, %176 : vector<8x128xf32>
    %178 = vector.broadcast %17 : f32 to vector<8x128xf32>
    %179 = arith.mulf %108, %178 : vector<8x128xf32>
    %180 = vector.broadcast %81 : f32 to vector<8x128xf32>
    %181 = arith.addf %179, %180 : vector<8x128xf32>
    %182 = vector.broadcast %25 : f32 to vector<8x128xf32>
    %183 = arith.mulf %114, %182 : vector<8x128xf32>
    %184 = arith.addf %181, %183 : vector<8x128xf32>
    %185 = vector.broadcast %33 : f32 to vector<8x128xf32>
    %186 = arith.mulf %120, %185 : vector<8x128xf32>
    %187 = arith.addf %184, %186 : vector<8x128xf32>
    %188 = vector.broadcast %41 : f32 to vector<8x128xf32>
    %189 = arith.mulf %126, %188 : vector<8x128xf32>
    %190 = arith.addf %187, %189 : vector<8x128xf32>
    %191 = vector.broadcast %49 : f32 to vector<8x128xf32>
    %192 = arith.mulf %132, %191 : vector<8x128xf32>
    %193 = arith.addf %190, %192 : vector<8x128xf32>
    %194 = vector.broadcast %57 : f32 to vector<8x128xf32>
    %195 = arith.mulf %138, %194 : vector<8x128xf32>
    %196 = arith.addf %193, %195 : vector<8x128xf32>
    %197 = vector.broadcast %65 : f32 to vector<8x128xf32>
    %198 = arith.mulf %144, %197 : vector<8x128xf32>
    %199 = arith.addf %196, %198 : vector<8x128xf32>
    %200 = vector.broadcast %73 : f32 to vector<8x128xf32>
    %201 = arith.mulf %150, %200 : vector<8x128xf32>
    %202 = arith.addf %199, %201 : vector<8x128xf32>
    %cst_43 = arith.constant 0.000000e+00 : f32
    %203 = vector.broadcast %cst_43 : f32 to vector<8x128xf32>
    %204 = arith.maximumf %202, %203 : vector<8x128xf32>
    %205 = vector.broadcast %18 : f32 to vector<8x128xf32>
    %206 = arith.mulf %108, %205 : vector<8x128xf32>
    %207 = vector.broadcast %82 : f32 to vector<8x128xf32>
    %208 = arith.addf %206, %207 : vector<8x128xf32>
    %209 = vector.broadcast %26 : f32 to vector<8x128xf32>
    %210 = arith.mulf %114, %209 : vector<8x128xf32>
    %211 = arith.addf %208, %210 : vector<8x128xf32>
    %212 = vector.broadcast %34 : f32 to vector<8x128xf32>
    %213 = arith.mulf %120, %212 : vector<8x128xf32>
    %214 = arith.addf %211, %213 : vector<8x128xf32>
    %215 = vector.broadcast %42 : f32 to vector<8x128xf32>
    %216 = arith.mulf %126, %215 : vector<8x128xf32>
    %217 = arith.addf %214, %216 : vector<8x128xf32>
    %218 = vector.broadcast %50 : f32 to vector<8x128xf32>
    %219 = arith.mulf %132, %218 : vector<8x128xf32>
    %220 = arith.addf %217, %219 : vector<8x128xf32>
    %221 = vector.broadcast %58 : f32 to vector<8x128xf32>
    %222 = arith.mulf %138, %221 : vector<8x128xf32>
    %223 = arith.addf %220, %222 : vector<8x128xf32>
    %224 = vector.broadcast %66 : f32 to vector<8x128xf32>
    %225 = arith.mulf %144, %224 : vector<8x128xf32>
    %226 = arith.addf %223, %225 : vector<8x128xf32>
    %227 = vector.broadcast %74 : f32 to vector<8x128xf32>
    %228 = arith.mulf %150, %227 : vector<8x128xf32>
    %229 = arith.addf %226, %228 : vector<8x128xf32>
    %cst_44 = arith.constant 0.000000e+00 : f32
    %230 = vector.broadcast %cst_44 : f32 to vector<8x128xf32>
    %231 = arith.maximumf %229, %230 : vector<8x128xf32>
    %232 = vector.broadcast %19 : f32 to vector<8x128xf32>
    %233 = arith.mulf %108, %232 : vector<8x128xf32>
    %234 = vector.broadcast %83 : f32 to vector<8x128xf32>
    %235 = arith.addf %233, %234 : vector<8x128xf32>
    %236 = vector.broadcast %27 : f32 to vector<8x128xf32>
    %237 = arith.mulf %114, %236 : vector<8x128xf32>
    %238 = arith.addf %235, %237 : vector<8x128xf32>
    %239 = vector.broadcast %35 : f32 to vector<8x128xf32>
    %240 = arith.mulf %120, %239 : vector<8x128xf32>
    %241 = arith.addf %238, %240 : vector<8x128xf32>
    %242 = vector.broadcast %43 : f32 to vector<8x128xf32>
    %243 = arith.mulf %126, %242 : vector<8x128xf32>
    %244 = arith.addf %241, %243 : vector<8x128xf32>
    %245 = vector.broadcast %51 : f32 to vector<8x128xf32>
    %246 = arith.mulf %132, %245 : vector<8x128xf32>
    %247 = arith.addf %244, %246 : vector<8x128xf32>
    %248 = vector.broadcast %59 : f32 to vector<8x128xf32>
    %249 = arith.mulf %138, %248 : vector<8x128xf32>
    %250 = arith.addf %247, %249 : vector<8x128xf32>
    %251 = vector.broadcast %67 : f32 to vector<8x128xf32>
    %252 = arith.mulf %144, %251 : vector<8x128xf32>
    %253 = arith.addf %250, %252 : vector<8x128xf32>
    %254 = vector.broadcast %75 : f32 to vector<8x128xf32>
    %255 = arith.mulf %150, %254 : vector<8x128xf32>
    %256 = arith.addf %253, %255 : vector<8x128xf32>
    %cst_45 = arith.constant 0.000000e+00 : f32
    %257 = vector.broadcast %cst_45 : f32 to vector<8x128xf32>
    %258 = arith.maximumf %256, %257 : vector<8x128xf32>
    %259 = vector.broadcast %20 : f32 to vector<8x128xf32>
    %260 = arith.mulf %108, %259 : vector<8x128xf32>
    %261 = vector.broadcast %84 : f32 to vector<8x128xf32>
    %262 = arith.addf %260, %261 : vector<8x128xf32>
    %263 = vector.broadcast %28 : f32 to vector<8x128xf32>
    %264 = arith.mulf %114, %263 : vector<8x128xf32>
    %265 = arith.addf %262, %264 : vector<8x128xf32>
    %266 = vector.broadcast %36 : f32 to vector<8x128xf32>
    %267 = arith.mulf %120, %266 : vector<8x128xf32>
    %268 = arith.addf %265, %267 : vector<8x128xf32>
    %269 = vector.broadcast %44 : f32 to vector<8x128xf32>
    %270 = arith.mulf %126, %269 : vector<8x128xf32>
    %271 = arith.addf %268, %270 : vector<8x128xf32>
    %272 = vector.broadcast %52 : f32 to vector<8x128xf32>
    %273 = arith.mulf %132, %272 : vector<8x128xf32>
    %274 = arith.addf %271, %273 : vector<8x128xf32>
    %275 = vector.broadcast %60 : f32 to vector<8x128xf32>
    %276 = arith.mulf %138, %275 : vector<8x128xf32>
    %277 = arith.addf %274, %276 : vector<8x128xf32>
    %278 = vector.broadcast %68 : f32 to vector<8x128xf32>
    %279 = arith.mulf %144, %278 : vector<8x128xf32>
    %280 = arith.addf %277, %279 : vector<8x128xf32>
    %281 = vector.broadcast %76 : f32 to vector<8x128xf32>
    %282 = arith.mulf %150, %281 : vector<8x128xf32>
    %283 = arith.addf %280, %282 : vector<8x128xf32>
    %cst_46 = arith.constant 0.000000e+00 : f32
    %284 = vector.broadcast %cst_46 : f32 to vector<8x128xf32>
    %285 = arith.maximumf %283, %284 : vector<8x128xf32>
    %286 = vector.broadcast %21 : f32 to vector<8x128xf32>
    %287 = arith.mulf %108, %286 : vector<8x128xf32>
    %288 = vector.broadcast %85 : f32 to vector<8x128xf32>
    %289 = arith.addf %287, %288 : vector<8x128xf32>
    %290 = vector.broadcast %29 : f32 to vector<8x128xf32>
    %291 = arith.mulf %114, %290 : vector<8x128xf32>
    %292 = arith.addf %289, %291 : vector<8x128xf32>
    %293 = vector.broadcast %37 : f32 to vector<8x128xf32>
    %294 = arith.mulf %120, %293 : vector<8x128xf32>
    %295 = arith.addf %292, %294 : vector<8x128xf32>
    %296 = vector.broadcast %45 : f32 to vector<8x128xf32>
    %297 = arith.mulf %126, %296 : vector<8x128xf32>
    %298 = arith.addf %295, %297 : vector<8x128xf32>
    %299 = vector.broadcast %53 : f32 to vector<8x128xf32>
    %300 = arith.mulf %132, %299 : vector<8x128xf32>
    %301 = arith.addf %298, %300 : vector<8x128xf32>
    %302 = vector.broadcast %61 : f32 to vector<8x128xf32>
    %303 = arith.mulf %138, %302 : vector<8x128xf32>
    %304 = arith.addf %301, %303 : vector<8x128xf32>
    %305 = vector.broadcast %69 : f32 to vector<8x128xf32>
    %306 = arith.mulf %144, %305 : vector<8x128xf32>
    %307 = arith.addf %304, %306 : vector<8x128xf32>
    %308 = vector.broadcast %77 : f32 to vector<8x128xf32>
    %309 = arith.mulf %150, %308 : vector<8x128xf32>
    %310 = arith.addf %307, %309 : vector<8x128xf32>
    %cst_47 = arith.constant 0.000000e+00 : f32
    %311 = vector.broadcast %cst_47 : f32 to vector<8x128xf32>
    %312 = arith.maximumf %310, %311 : vector<8x128xf32>
    %313 = vector.broadcast %22 : f32 to vector<8x128xf32>
    %314 = arith.mulf %108, %313 : vector<8x128xf32>
    %315 = vector.broadcast %86 : f32 to vector<8x128xf32>
    %316 = arith.addf %314, %315 : vector<8x128xf32>
    %317 = vector.broadcast %30 : f32 to vector<8x128xf32>
    %318 = arith.mulf %114, %317 : vector<8x128xf32>
    %319 = arith.addf %316, %318 : vector<8x128xf32>
    %320 = vector.broadcast %38 : f32 to vector<8x128xf32>
    %321 = arith.mulf %120, %320 : vector<8x128xf32>
    %322 = arith.addf %319, %321 : vector<8x128xf32>
    %323 = vector.broadcast %46 : f32 to vector<8x128xf32>
    %324 = arith.mulf %126, %323 : vector<8x128xf32>
    %325 = arith.addf %322, %324 : vector<8x128xf32>
    %326 = vector.broadcast %54 : f32 to vector<8x128xf32>
    %327 = arith.mulf %132, %326 : vector<8x128xf32>
    %328 = arith.addf %325, %327 : vector<8x128xf32>
    %329 = vector.broadcast %62 : f32 to vector<8x128xf32>
    %330 = arith.mulf %138, %329 : vector<8x128xf32>
    %331 = arith.addf %328, %330 : vector<8x128xf32>
    %332 = vector.broadcast %70 : f32 to vector<8x128xf32>
    %333 = arith.mulf %144, %332 : vector<8x128xf32>
    %334 = arith.addf %331, %333 : vector<8x128xf32>
    %335 = vector.broadcast %78 : f32 to vector<8x128xf32>
    %336 = arith.mulf %150, %335 : vector<8x128xf32>
    %337 = arith.addf %334, %336 : vector<8x128xf32>
    %cst_48 = arith.constant 0.000000e+00 : f32
    %338 = vector.broadcast %cst_48 : f32 to vector<8x128xf32>
    %339 = arith.maximumf %337, %338 : vector<8x128xf32>
    %340 = vector.broadcast %23 : f32 to vector<8x128xf32>
    %341 = arith.mulf %108, %340 : vector<8x128xf32>
    %342 = vector.broadcast %87 : f32 to vector<8x128xf32>
    %343 = arith.addf %341, %342 : vector<8x128xf32>
    %344 = vector.broadcast %31 : f32 to vector<8x128xf32>
    %345 = arith.mulf %114, %344 : vector<8x128xf32>
    %346 = arith.addf %343, %345 : vector<8x128xf32>
    %347 = vector.broadcast %39 : f32 to vector<8x128xf32>
    %348 = arith.mulf %120, %347 : vector<8x128xf32>
    %349 = arith.addf %346, %348 : vector<8x128xf32>
    %350 = vector.broadcast %47 : f32 to vector<8x128xf32>
    %351 = arith.mulf %126, %350 : vector<8x128xf32>
    %352 = arith.addf %349, %351 : vector<8x128xf32>
    %353 = vector.broadcast %55 : f32 to vector<8x128xf32>
    %354 = arith.mulf %132, %353 : vector<8x128xf32>
    %355 = arith.addf %352, %354 : vector<8x128xf32>
    %356 = vector.broadcast %63 : f32 to vector<8x128xf32>
    %357 = arith.mulf %138, %356 : vector<8x128xf32>
    %358 = arith.addf %355, %357 : vector<8x128xf32>
    %359 = vector.broadcast %71 : f32 to vector<8x128xf32>
    %360 = arith.mulf %144, %359 : vector<8x128xf32>
    %361 = arith.addf %358, %360 : vector<8x128xf32>
    %362 = vector.broadcast %79 : f32 to vector<8x128xf32>
    %363 = arith.mulf %150, %362 : vector<8x128xf32>
    %364 = arith.addf %361, %363 : vector<8x128xf32>
    %cst_49 = arith.constant 0.000000e+00 : f32
    %365 = vector.broadcast %cst_49 : f32 to vector<8x128xf32>
    %366 = arith.maximumf %364, %365 : vector<8x128xf32>
    %367 = vector.broadcast %88 : f32 to vector<8x128xf32>
    %368 = arith.mulf %177, %367 : vector<8x128xf32>
    %369 = vector.broadcast %96 : f32 to vector<8x128xf32>
    %370 = arith.addf %368, %369 : vector<8x128xf32>
    %371 = vector.broadcast %89 : f32 to vector<8x128xf32>
    %372 = arith.mulf %204, %371 : vector<8x128xf32>
    %373 = arith.addf %370, %372 : vector<8x128xf32>
    %374 = vector.broadcast %90 : f32 to vector<8x128xf32>
    %375 = arith.mulf %231, %374 : vector<8x128xf32>
    %376 = arith.addf %373, %375 : vector<8x128xf32>
    %377 = vector.broadcast %91 : f32 to vector<8x128xf32>
    %378 = arith.mulf %258, %377 : vector<8x128xf32>
    %379 = arith.addf %376, %378 : vector<8x128xf32>
    %380 = vector.broadcast %92 : f32 to vector<8x128xf32>
    %381 = arith.mulf %285, %380 : vector<8x128xf32>
    %382 = arith.addf %379, %381 : vector<8x128xf32>
    %383 = vector.broadcast %93 : f32 to vector<8x128xf32>
    %384 = arith.mulf %312, %383 : vector<8x128xf32>
    %385 = arith.addf %382, %384 : vector<8x128xf32>
    %386 = vector.broadcast %94 : f32 to vector<8x128xf32>
    %387 = arith.mulf %339, %386 : vector<8x128xf32>
    %388 = arith.addf %385, %387 : vector<8x128xf32>
    %389 = vector.broadcast %95 : f32 to vector<8x128xf32>
    %390 = arith.mulf %366, %389 : vector<8x128xf32>
    %391 = arith.addf %388, %390 : vector<8x128xf32>
    %392 = arith.index_cast %100 : i32 to index
    %c0_50 = arith.constant 0 : index
    %393 = vector.load %arg8[%392, %c0_50] : memref<8x128xf32, #tpu.memory_space<vmem>>, vector<8x128xf32>
    tpu.vector_store %arg8[%392, %c0_50], %391 {strides = array<i32>} : memref<8x128xf32, #tpu.memory_space<vmem>>, vector<8x128xf32>,
    %c1_i32_51 = arith.constant 1 : i32
    return
  }
  func.func @transform_0(%arg0: i32) -> (i32, i32) {
    %c0_i32 = arith.constant 0 : i32
    %c0_i32_0 = arith.constant 0 : i32
    return %arg0, %c0_i32 : i32, i32
  }
  func.func @transform_1(%arg0: i32) -> i32 {
    %c0_i32 = arith.constant 0 : i32
    %c0_i32_0 = arith.constant 0 : i32
    return %c0_i32 : i32
  }
  func.func @transform_2(%arg0: i32) -> i32 {
    %c0_i32 = arith.constant 0 : i32
    %c0_i32_0 = arith.constant 0 : i32
    return %c0_i32 : i32
  }
  func.func @transform_3(%arg0: i32) -> i32 {
    %c0_i32 = arith.constant 0 : i32
    %c0_i32_0 = arith.constant 0 : i32
    return %c0_i32 : i32
  }
  func.func @transform_4(%arg0: i32) -> i32 {
    %c0_i32 = arith.constant 0 : i32
    %c0_i32_0 = arith.constant 0 : i32
    return %c0_i32 : i32
  }
  func.func @transform_5(%arg0: i32) -> i32 {
    %c0_i32 = arith.constant 0 : i32
    %c0_i32_0 = arith.constant 0 : i32
    return %c0_i32 : i32
  }
  func.func @transform_6(%arg0: i32) -> i32 {
    %c0_i32 = arith.constant 0 : i32
    %c0_i32_0 = arith.constant 0 : i32
    return %c0_i32 : i32
  }
  func.func @transform_7(%arg0: i32) -> (i32, i32) {
    %c0_i32 = arith.constant 0 : i32
    %c0_i32_0 = arith.constant 0 : i32
    return %arg0, %c0_i32 : i32, i32
  }
}

</mosaic_0001>

<bundles_post_ra>
// kernel: tpu_custom_call.1
= control target key start
LH: loop header
LB: loop body
LE: loop exit
PB: predicated region body
PF: predicated region fallthrough
CT: control target
= control target key end

     0   :  { %s1309_s0 = inlined_call_operand.hbm [shape: f32[8,128], index: 0, kind: input, shape index: {}]   ;;  %s1310_s1 = inlined_call_operand.vmem [shape: f32[8], index: 1, kind: input, shape index: {}]   ;;  %s1311_s2 = inlined_call_operand.vmem [shape: f32[8], index: 2, kind: input, shape index: {}]   ;;  %s1312_s3 = inlined_call_operand.vmem [shape: f32[64], index: 3, kind: input, shape index: {}]   ;;  %s1313_s4 = inlined_call_operand.vmem [shape: f32[8], index: 4, kind: input, shape index: {}]   ;;  %s1314_s5 = inlined_call_operand.vmem [shape: f32[8], index: 5, kind: input, shape index: {}]   ;;  %s1315_s6 = inlined_call_operand.<no memory space> [shape: f32[1], index: 6, kind: input, shape index: {}]   ;;  %s1316_s7 = inlined_call_operand.hbm [shape: f32[8,128], index: 7, kind: output, shape index: {}]  }
   0x1   :  { %1318 = sst [smem:[#allocation49_spill]] %s1315_s6 }
   0x2   :  { %1319 = sst [smem:[#allocation50_spill]] %s1316_s7 }
   0x3   :  { %13 = vsyncpa [#allocation4], 0 }
   0x4   :  { %14 = vsyncpa [#allocation6], 0 }
   0x5   :  { %15 = vsyncpa [#allocation9], 0 }
   0x6   :  { %16 = vsyncpa [#allocation12], 0  ;;  %s44_s26 = sshll.u32 %s1311_s2, 4  ;;  %s45_s26 = int_to_ptr.vmem [resolvable:$true] %s44_s26 }
   0x7   :  { %17 = vsyncpa [#allocation5], 0  ;;  %s64_s29 = sshll.u32 %s1313_s4, 4  ;;  %s587_s30 = scalar_lea.vmem %s45_s26, 16  ;;  %s65_s29 = int_to_ptr.vmem [resolvable:$true] %s64_s29 }
   0x8   :  { %p588_p0 = scmp.ne.s32.totalorder %s45_s26, %s587_s30  ;;  %p592_p1 = scmp.lt.s32.totalorder %s45_s26, %s45_s26 }
   0x9   :  { %p593_p2 = scmp.lt.s32.totalorder %s587_s30, %s587_s30 }
   0xb   :  { %p594_p3 = por %p593_p2, %p592_p1 }
   0xd   :  { %p595_p4 = pnand %p594_p3, %p588_p0 }
   0xf   :  { %598 = shalt.err (!%p595_p4)
}
  0x10   :  { %s697_s8 = smov [#allocation8]   ;;  %s599_s9 = scalar_lea.vmem %s65_s29, 16 }
  0x11   :  { %47 = dma.vmem_to_smem %s45_s26, 16, %s697_s8, [#allocation9]  }
  0x12   :  { %p600_p5 = scmp.ne.s32.totalorder %s65_s29, %s599_s9  ;;  %p604_p6 = scmp.lt.s32.totalorder %s65_s29, %s65_s29 }
  0x13   :  { %p605_p7 = scmp.lt.s32.totalorder %s599_s9, %s599_s9 }
  0x15   :  { %p606_p8 = por %p605_p7, %p604_p6 }
  0x17   :  { %p607_p9 = pnand %p606_p8, %p600_p5 }
  0x19   :  { %610 = shalt.err (!%p607_p9)
}
  0x1a   :  { %s698_s2 = smov [#allocation11]   ;;  %s34_s11 = sshll.u32 %s1310_s1, 4  ;;  %s35_s11 = int_to_ptr.vmem [resolvable:$true] %s34_s11 }
  0x1b   :  { %67 = dma.vmem_to_smem %s65_s29, 16, %s698_s2, [#allocation12]  }
  0x1c   :  { %s699_s12 = smov [#allocation3]  }
  0x1d   :  { %s24_s13 = sshll.u32 %s699_s12, 4  ;;  %s25_s13 = int_to_ptr.vmem [resolvable:$true] %s24_s13 }
  0x1e   :  { %s619_s14 = scalar_lea.vmem %s25_s13, 128  ;;  %p624_p11 = scmp.lt.s32.totalorder %s25_s13, %s25_s13 }
  0x1f   :  { %p620_p10 = scmp.ne.s32.totalorder %s25_s13, %s619_s14  ;;  %p625_p12 = scmp.lt.s32.totalorder %s619_s14, %s619_s14 }
  0x21   :  { %p626_p13 = por %p625_p12, %p624_p11 }
  0x23   :  { %p627_p0 = pnand %p626_p13, %p620_p10 }
  0x25   :  { %630 = shalt.err (!%p627_p0)
}
  0x26   :  { %27 = dma.hbm_to_vmem [thread:$0]  %s1309_s0, 128, %s25_s13, [#allocation4]  }
  0x27   :  { %s631_s17 = scalar_lea.vmem %s35_s11, 16  ;;  %p636_p2 = scmp.lt.s32.totalorder %s35_s11, %s35_s11 }
  0x28   :  { %p632_p1 = scmp.ne.s32.totalorder %s35_s11, %s631_s17  ;;  %p637_p3 = scmp.lt.s32.totalorder %s631_s17, %s631_s17 }
  0x2a   :  { %p638_p4 = por %p637_p3, %p636_p2 }
  0x2c   :  { %p639_p5 = pnand %p638_p4, %p632_p1 }
  0x2e   :  { %642 = shalt.err (!%p639_p5)
}
  0x2f   :  { %s700_s1 = smov [#allocation7]   ;;  %s54_s20 = sshll.u32 %s1312_s3, 4  ;;  %s55_s20 = int_to_ptr.vmem [resolvable:$true] %s54_s20 }
  0x30   :  { %37 = dma.vmem_to_smem %s35_s11, 16, %s700_s1, [#allocation6]  }
  0x31   :  { %s74_s23 = sshll.u32 %s1314_s5, 4  ;;  %s643_s24 = scalar_lea.vmem %s55_s20, 16  ;;  %s75_s23 = int_to_ptr.vmem [resolvable:$true] %s74_s23 }
  0x32   :  { %p644_p6 = scmp.ne.s32.totalorder %s55_s20, %s643_s24  ;;  %p648_p7 = scmp.lt.s32.totalorder %s55_s20, %s55_s20 }
  0x33   :  { %p649_p8 = scmp.lt.s32.totalorder %s643_s24, %s643_s24 }
  0x35   :  { %p650_p9 = por %p649_p8, %p648_p7 }
  0x37   :  { %p651_p10 = pnand %p650_p9, %p644_p6 }
  0x39   :  { %654 = shalt.err (!%p651_p10)
}
  0x3a   :  { %s701_s0 = smov [#allocation10]   ;;  %s655_s25 = scalar_lea.vmem %s75_s23, 16 }
  0x3b   :  { %57 = dma.vmem_to_smem %s55_s20, 16, %s701_s0, [#allocation9]  }
  0x3c   :  { %p656_p11 = scmp.ne.s32.totalorder %s75_s23, %s655_s25  ;;  %p660_p12 = scmp.lt.s32.totalorder %s75_s23, %s75_s23 }
  0x3d   :  { %p661_p13 = scmp.lt.s32.totalorder %s655_s25, %s655_s25 }
  0x3f   :  { %p662_p0 = por %p661_p13, %p660_p12 }
  0x41   :  { %p663_p1 = pnand %p662_p0, %p656_p11 }
  0x43   :  { %666 = shalt.err (!%p663_p1)
}
  0x44   :  { %s702_s3 = smov [#allocation13]  }
  0x45   :  { %77 = dma.vmem_to_smem %s75_s23, 16, %s702_s3, [#allocation12]  }
  0x46   :  { %687 = dma.done.wait [#allocation4], 128  }
  0x47   :  { %688 = vsyncadd [#allocation4], 4294967168 }
  0x48   :  { %689 = dma.done.wait [#allocation6], 16  }
  0x49   :  { %690 = vsyncadd [#allocation6], 4294967280 }
  0x4a   :  { %691 = dma.done.wait [#allocation9], 32  }
  0x4b   :  { %692 = vsyncadd [#allocation9], 4294967264 }
  0x4c   :  { %693 = dma.done.wait [#allocation12], 32  }
  0x4d   :  { %694 = vsyncadd [#allocation12], 4294967264 }
  0x4e   :  { %98 = sfence }
  0x4f   :  { %s762_s5 = sld [smem:[#allocation7]]  ;;  %v196_v0 = vld [vmem:[#allocation3] sm:$0xff] }
  0x50   :  { %s764_s26 = sld [smem:[#allocation7 + $0x1]] }
  0x51   :  { %s766_s27 = sld [smem:[#allocation7 + $0x2]] }
  0x52   :  { %s768_s28 = sld [smem:[#allocation7 + $0x3]] }
  0x53   :  { %s770_s29 = sld [smem:[#allocation7 + $0x4]] }
  0x54   :  { %s772_s30 = sld [smem:[#allocation7 + $0x5]] }
  0x55   :  { %s774_s8 = sld [smem:[#allocation7 + $0x6]]  ;;  %v197_v1 = vstv %s762_s5 }
  0x56   :  { %s776_s9 = sld [smem:[#allocation7 + $0x7]]  ;;  %v202_v2 = vstv %s764_s26  ;;  %v198_v7 = vmul.f32 %v197_v1, %v196_v0 }
  0x57   :  { %s778_s2 = sld [smem:[#allocation8]]  ;;  %v207_v3 = vstv %s766_s27  ;;  %v203_v10 = vmul.f32 %v202_v2, %v196_v0 }
  0x58   :  { %s780_s4 = sld [smem:[#allocation8 + $0x1]]  ;;  %v212_v4 = vstv %s768_s28  ;;  %v208_v11 = vmul.f32 %v207_v3, %v196_v0 }
  0x59   :  { %s782_s10 = sld [smem:[#allocation8 + $0x2]]  ;;  %v217_v5 = vstv %s770_s29  ;;  %v213_v12 = vmul.f32 %v212_v4, %v196_v0 }
  0x5a   :  { %s784_s11 = sld [smem:[#allocation8 + $0x3]]  ;;  %v222_v6 = vstv %s772_s30  ;;  %v218_v14 = vmul.f32 %v217_v5, %v196_v0 }
  0x5b   :  { %s786_s12 = sld [smem:[#allocation8 + $0x4]]  ;;  %v227_v8 = vstv %s774_s8  ;;  %v223_v15 = vmul.f32 %v222_v6, %v196_v0 }
  0x5c   :  { %s788_s13 = sld [smem:[#allocation8 + $0x5]]  ;;  %v232_v16 = vstv %s776_s9  ;;  %v228_v20 = vmul.f32 %v227_v8, %v196_v0 }
  0x5d   :  { %s790_s14 = sld [smem:[#allocation8 + $0x6]]  ;;  %v199_v9 = vstv %s778_s2  ;;  %v233_v25 = vmul.f32 %v232_v16, %v196_v0 }
  0x5e   :  { %s792_s15 = sld [smem:[#allocation8 + $0x7]]  ;;  %v204_v13 = vstv %s780_s4  ;;  %v200_v21 = vadd.f32 %v199_v9, %v198_v7 }
  0x5f   :  { %s794_s16 = sld [smem:[#allocation10]]  ;;  %v209_v17 = vstv %s782_s10  ;;  %v205_v24 = vadd.f32 %v204_v13, %v203_v10 }
  0x60   :  { %s796_s17 = sld [smem:[#allocation10 + $0x1]]  ;;  %v214_v18 = vstv %s784_s11  ;;  %v210_v26 = vadd.f32 %v209_v17, %v208_v11  ;;  %v201_v32 = vmax.f32 %v200_v21, 0.0 }
  0x61   :  { %s798_s1 = sld [smem:[#allocation10 + $0x2]]  ;;  %v219_v19 = vstv %s786_s12  ;;  %v215_v27 = vadd.f32 %v214_v18, %v213_v12  ;;  %v206_v33 = vmax.f32 %v205_v24, 0.0 }
  0x62   :  { %s800_s18 = sld [smem:[#allocation10 + $0x3]]  ;;  %v224_v22 = vstv %s788_s13  ;;  %v220_v28 = vadd.f32 %v219_v19, %v218_v14  ;;  %v894_v37 = vmax.f32 %v210_v26, 0.0 }
  0x63   :  { %s802_s19 = sld [smem:[#allocation10 + $0x4]]  ;;  %v229_v23 = vstv %s790_s14  ;;  %v225_v30 = vadd.f32 %v224_v22, %v223_v15  ;;  %v896_v38 = vmax.f32 %v215_v27, 0.0 }
  0x64   :  { %s804_s20 = sld [smem:[#allocation10 + $0x5]]  ;;  %v234_v29 = vstv %s792_s15  ;;  %v230_v31 = vadd.f32 %v229_v23, %v228_v20  ;;  %v898_v39 = vmax.f32 %v220_v28, 0.0 }
  0x65   :  { %s806_s21 = sld [smem:[#allocation10 + $0x6]]  ;;  %v235_v34 = vadd.f32 %v234_v29, %v233_v25  ;;  %v237_v35 = vstv %s794_s16  ;;  %v903_v41 = vmax.f32 %v225_v30, 0.0 }
  0x66   :  { %s808_s22 = sld [smem:[#allocation10 + $0x7]]  ;;  %v263_v40 = vstv %s796_s17  ;;  %v905_v42 = vmax.f32 %v230_v31, 0.0  ;;  %v911_v45 = vmul.f32 %v237_v35, %v201_v32 }
  0x67   :  { %s810_s23 = sld [smem:[#allocation10 + $0x8]]  ;;  %v289_v43 = vstv %s798_s1  ;;  %v918_v49 = vmax.f32 %v235_v34, 0.0  ;;  %v921_v51 = vmul.f32 %v263_v40, %v201_v32 }
  0x68   :  { %s812_s24 = sld [smem:[#allocation10 + $0x9]]  ;;  %v315_v44 = vstv %s800_s18  ;;  %v927_v54 = vmul.f32 %v289_v43, %v201_v32 }
  0x69   :  { %s814_s0 = sld [smem:[#allocation10 + $0xa]]  ;;  %v341_v46 = vstv %s802_s19  ;;  %v930_v56 = vmul.f32 %v315_v44, %v201_v32 }
  0x6a   :  { %1320 = sst [smem:[#allocation20_spill]] %s804_s20  ;;  %v935_v58 = vmul.f32 %v341_v46, %v201_v32 }
  0x6b   :  { %s816_s25 = sld [smem:[#allocation10 + $0xb]]  ;;  %v393_v48 = vstv %s806_s21 }
  0x6c   :  { %1321 = sst [smem:[#allocation21_spill]] %s808_s22  ;;  %v939_v60 = vmul.f32 %v393_v48, %v201_v32 }
  0x6d   :  { %1322 = sst [smem:[#allocation22_spill]] %s810_s23 }
  0x6e   :  { %1323 = sst [smem:[#allocation23_spill]] %s812_s24 }
  0x6f   :  { %1324 = sst [smem:[#allocation24_spill]] %s814_s0 }
  0x70   :  { %s818_s3 = sld [smem:[#allocation10 + $0xc]] }
  0x71   :  { %1325 = sst [smem:[#allocation25_spill]] %s816_s25 }
  0x72   :  { %s820_s7 = sld [smem:[#allocation10 + $0xd]] }
  0x73   :  { %s822_s6 = sld [smem:[#allocation10 + $0xe]] }
  0x74   :  { %s824_s20 = sld [smem:[#allocation10 + $0xf]] }
  0x75   :  { %s826_s22 = sld [smem:[#allocation10 + $0x10]] }
  0x76   :  { %1326 = sst [smem:[#allocation26_spill]] %s818_s3 }
  0x77   :  { %s828_s23 = sld [smem:[#allocation10 + $0x11]] }
  0x78   :  { %1327 = sst [smem:[#allocation27_spill]] %s820_s7 }
  0x79   :  { %1328 = sst [smem:[#allocation28_spill]] %s822_s6 }
  0x7a   :  { %1329 = sst [smem:[#allocation29_spill]] %s824_s20 }
  0x7b   :  { %1330 = sst [smem:[#allocation30_spill]] %s826_s22 }
  0x7c   :  { %s830_s24 = sld [smem:[#allocation10 + $0x12]] }
  0x7d   :  { %1331 = sst [smem:[#allocation31_spill]] %s828_s23 }
  0x7e   :  { %s832_s25 = sld [smem:[#allocation10 + $0x13]] }
  0x7f   :  { %s834_s3 = sld [smem:[#allocation10 + $0x14]] }
  0x80   :  { %s836_s7 = sld [smem:[#allocation10 + $0x15]] }
  0x81   :  { %s838_s6 = sld [smem:[#allocation10 + $0x16]] }
  0x82   :  { %s840_s20 = sld [smem:[#allocation10 + $0x17]]  ;;  %v296_v7 = vstv %s830_s24 }
  0x83   :  { %s842_s0 = sld [smem:[#allocation10 + $0x18]]  ;;  %v989_v19 = vmul.f32 %v296_v7, %v894_v37 }
  0x84   :  { %1332 = sst [smem:[#allocation32_spill]] %s832_s25 }
  0x85   :  { %s844_s22 = sld [smem:[#allocation10 + $0x19]]  ;;  %v348_v11 = vstv %s834_s3 }
  0x86   :  { %s846_s23 = sld [smem:[#allocation10 + $0x1a]]  ;;  %v374_v13 = vstv %s836_s7  ;;  %v1000_v24 = vmul.f32 %v348_v11, %v894_v37 }
  0x87   :  { %1333 = sst [smem:[#allocation33_spill]] %s838_s6  ;;  %v1007_v27 = vmul.f32 %v374_v13, %v894_v37 }
  0x88   :  { %s849_s25 = sld [smem:[#allocation10 + $0x1b]]  ;;  %v426_v20 = vstv %s840_s20 }
  0x89   :  { %1334 = sst [smem:[#allocation34_spill]] %s842_s0 }
  0x8a   :  { %s854_s6 = sld [smem:[#allocation10 + $0x1c]] }
  0x8b   :  { %s858_s0 = sld [smem:[#allocation10 + $0x1d]]  ;;  %v273_v22 = vstv %s844_s22 }
  0x8c   :  { %1335 = sst [smem:[#allocation35_spill]] %s846_s23  ;;  %v1027_v35 = vmul.f32 %v273_v22, %v896_v38 }
  0x8d   :  { %s861_s23 = sld [smem:[#allocation10 + $0x1e]] }
  0x8e   :  { %s864_s5 = sld [smem:[#allocation10 + $0x1f]]  ;;  %v325_v26 = vstv %s849_s25 }
  0x8f   :  { %s868_s26 = sld [smem:[#allocation10 + $0x20]]  ;;  %v1038_v46 = vmul.f32 %v325_v26, %v896_v38 }
  0x90   :  { %s873_s27 = sld [smem:[#allocation10 + $0x21]]  ;;  %v351_v29 = vstv %s854_s6 }
  0x91   :  { %s877_s28 = sld [smem:[#allocation10 + $0x22]]  ;;  %v377_v30 = vstv %s858_s0  ;;  %v1044_v48 = vmul.f32 %v351_v29, %v896_v38 }
  0x92   :  { %s879_s29 = sld [smem:[#allocation10 + $0x23]] }
  0x93   :  { %s882_s30 = sld [smem:[#allocation10 + $0x24]]  ;;  %v403_v31 = vstv %s861_s23 }
  0x94   :  { %s884_s8 = sld [smem:[#allocation10 + $0x25]]  ;;  %v429_v40 = vstv %s864_s5 }
  0x95   :  { %s886_s9 = sld [smem:[#allocation10 + $0x26]]  ;;  %v250_v34 = vstv %s868_s26 }
  0x96   :  { %s1337_s2 = sld [smem:[#allocation20_spill]]  ;;  %v276_v43 = vstv %s873_s27 }
  0x97   :  { %s892_s12 = sld [smem:[#allocation10 + $0x27]] }
  0x98   :  { %s1339_s13 = sld [smem:[#allocation22_spill]] }
  0x99   :  { %s1340_s14 = sld [smem:[#allocation21_spill]] }
  0x9a   :  { %s901_s15 = sld [smem:[#allocation10 + $0x28]] }
  0x9b   :  { %1336 = sst [smem:[#allocation36_spill]] %s886_s9 }
  0x9c   :  { %s1342_s9 = sld [smem:[#allocation23_spill]]  ;;  %v367_v47 = vstv %s1337_s2 }
  0x9d   :  { %s1343_s16 = sld [smem:[#allocation24_spill]]  ;;  %v937_v59 = vmul.f32 %v367_v47, %v201_v32  ;;  %v328_v47 = vstv %s879_s29 }
  0x9e   :  { %s909_s4 = sld [smem:[#allocation10 + $0x29]]  ;;  %v241_v50 = vstv %s1339_s13 }
  0x9f   :  { %s1344_s10 = sld [smem:[#allocation25_spill]]  ;;  %v419_v52 = vstv %s1340_s14  ;;  %v943_v61 = vmul.f32 %v241_v50, %v206_v33  ;;  %v1047_v50 = vmul.f32 %v377_v30, %v896_v38 }
  0xa0   :  { %1341 = sst [smem:[#allocation20_spill]] %s901_s15  ;;  %v947_v0 = vmul.f32 %v419_v52, %v201_v32  ;;  %v1018_v32 = vmul.f32 %v426_v20, %v894_v37  ;;  %v1050_v52 = vmul.f32 %v403_v31, %v896_v38 }
  0xa1   :  { %s916_s11 = sld [smem:[#allocation10 + $0x2a]] }
  0xa2   :  { %s1346_s17 = sld [smem:[#allocation26_spill]]  ;;  %v267_v53 = vstv %s1342_s9 }
  0xa3   :  { %s1347_s15 = sld [smem:[#allocation27_spill]]  ;;  %v293_v55 = vstv %s1343_s16  ;;  %v951_v1 = vmul.f32 %v267_v53, %v206_v33  ;;  %v1055_v53 = vmul.f32 %v250_v34, %v898_v39 }
  0xa4   :  { %s924_s1 = sld [smem:[#allocation10 + $0x2b]]  ;;  %v953_v2 = vmul.f32 %v293_v55, %v206_v33  ;;  %v354_v55 = vstv %s882_s30  ;;  %v279_v7 = vstv %s909_s4 }
  0xa5   :  { %s1348_s18 = sld [smem:[#allocation28_spill]]  ;;  %v319_v57 = vstv %s1344_s10  ;;  %v1084_v13 = vmul.f32 %v354_v55, %v898_v39  ;;  %v1106_v30 = vmul.f32 %v279_v7, %v903_v41 }
  0xa6   :  { %s1349_s19 = sld [smem:[#allocation29_spill]]  ;;  %v962_v8 = vmul.f32 %v319_v57, %v206_v33  ;;  %v380_v57 = vstv %s884_s8 }
  0xa7   :  { %1345 = sst [smem:[#allocation22_spill]] %s916_s11  ;;  %v1088_v20 = vmul.f32 %v380_v57, %v898_v39 }
  0xa8   :  { %s932_s21 = sld [smem:[#allocation10 + $0x2c]]  ;;  %v345_v62 = vstv %s1346_s17 }
  0xa9   :  { %s1350_s2 = sld [smem:[#allocation30_spill]]  ;;  %v371_v63 = vstv %s1347_s15  ;;  %v967_v10 = vmul.f32 %v345_v62, %v206_v33  ;;  %v1060_v62 = vmul.f32 %v429_v40, %v896_v38 }
  0xaa   :  { %s1351_s11 = sld [smem:[#allocation31_spill]]  ;;  %v970_v12 = vmul.f32 %v371_v63, %v206_v33  ;;  %v1065_v63 = vmul.f32 %v276_v43, %v898_v39  ;;  %v331_v11 = vstv %s924_s1 }
  0xab   :  { %s941_s9 = sld [smem:[#allocation10 + $0x2d]]  ;;  %v397_v3 = vstv %s1348_s18  ;;  %1359 = vst [vmem:[#allocation37_spill] sm:$0xff] %v1060_v62  ;;  %v1117_v43 = vmul.f32 %v331_v11, %v903_v41 }
  0xac   :  { %s1352_s13 = sld [smem:[#allocation32_spill]]  ;;  %v423_v4 = vstv %s1349_s19  ;;  %v975_v14 = vmul.f32 %v397_v3, %v206_v33 }
  0xad   :  { %s949_s14 = sld [smem:[#allocation10 + $0x2e]]  ;;  %v978_v16 = vmul.f32 %v423_v4, %v206_v33 }
  0xae   :  { %s1353_s16 = sld [smem:[#allocation33_spill]] }
  0xaf   :  { %s957_s10 = sld [smem:[#allocation10 + $0x2f]]  ;;  %v244_v5 = vstv %s1350_s2 }
  0xb0   :  { %v270_v6 = vstv %s1351_s11  ;;  %s964_s15 = sld [smem:[#allocation10 + $0x30]]  ;;  %v983_v17 = vmul.f32 %v244_v5, %v894_v37  ;;  %v432_v5 = vstv %s892_s12 }
  0xb1   :  { %s1354_s17 = sld [smem:[#allocation34_spill]]  ;;  %v986_v18 = vmul.f32 %v270_v6, %v894_v37  ;;  %v1098_v26 = vmul.f32 %v432_v5, %v898_v39 }
  0xb2   :  { %v322_v9 = vstv %s1352_s13  ;;  %s972_s18 = sld [smem:[#allocation10 + $0x31]] }
  0xb3   :  { %s1355_s19 = sld [smem:[#allocation35_spill]]  ;;  %v997_v23 = vmul.f32 %v322_v9, %v894_v37  ;;  %1360 = vst [vmem:[#allocation38_spill] sm:$0xff] %v1098_v26 }
  0xb4   :  { %v400_v15 = vstv %s1353_s16  ;;  %s980_s24 = sld [smem:[#allocation10 + $0x32]] }
  0xb5   :  { %s992_s7 = sld [smem:[#allocation10 + $0x33]]  ;;  %v1010_v28 = vmul.f32 %v400_v15, %v894_v37  ;;  %v302_v37 = vstv %s877_s28  ;;  %v357_v15 = vstv %s932_s21  ;;  %v435_v34 = vstv %s957_s10 }
  0xb6   :  { %s1002_s3 = sld [smem:[#allocation10 + $0x34]]  ;;  %v1068_v3 = vmul.f32 %v302_v37, %v898_v39  ;;  %v256_v40 = vstv %s964_s15  ;;  %v1120_v37 = vmul.f32 %v357_v15, %v903_v41 }
  0xb7   :  { %v247_v21 = vstv %s1354_s17  ;;  %s1012_s20 = sld [smem:[#allocation10 + $0x35]]  ;;  %v1143_v11 = vmul.f32 %v256_v40, %v905_v42 }
  0xb8   :  { %s1020_s22 = sld [smem:[#allocation10 + $0x36]]  ;;  %v1023_v33 = vmul.f32 %v247_v21, %v896_v38  ;;  %v383_v21 = vstv %s941_s9 }
  0xb9   :  { %v299_v25 = vstv %s1355_s19  ;;  %s1030_s25 = sld [smem:[#allocation10 + $0x37]]  ;;  %v1127_v57 = vmul.f32 %v383_v21, %v903_v41 }
  0xba   :  { %v1034_v44 = vmul.f32 %v299_v25, %v896_v38  ;;  %s1356_s6 = sld [smem:[#allocation36_spill]]  ;;  %v1078_v38 = vmul.f32 %v328_v47, %v898_v39  ;;  %v409_v25 = vstv %s949_s14  ;;  %v308_v47 = vstv %s980_s24 }
  0xbb   :  { %s1040_s23 = sld [smem:[#allocation10 + $0x38]]  ;;  %v334_v55 = vstv %s992_s7  ;;  %1361 = vst [vmem:[#allocation39_spill] sm:$0xff] %v1127_v57  ;;  %v1154_v26 = vmul.f32 %v308_v47, %v905_v42 }
  0xbc   :  { %s1357_s0 = sld [smem:[#allocation20_spill]]  ;;  %v360_v5 = vstv %s1002_s3 }
  0xbd   :  { %s1358_s5 = sld [smem:[#allocation22_spill]] }
  0xbe   :  { %s1052_s26 = sld [smem:[#allocation10 + $0x39]]  ;;  %v412_v7 = vstv %s1020_s22 }
  0xbf   :  { %s1062_s27 = sld [smem:[#allocation10 + $0x3a]] }
  0xc0   :  { %v406_v4 = vstv %s1356_s6  ;;  %s1072_s28 = sld [smem:[#allocation10 + $0x3b]] }
  0xc1   :  { %s1080_s29 = sld [smem:[#allocation10 + $0x3c]]  ;;  %v1094_v22 = vmul.f32 %v406_v4, %v898_v39  ;;  %v282_v39 = vstv %s972_s18  ;;  %v1130_v4 = vmul.f32 %v409_v25, %v903_v41  ;;  %v259_v15 = vstv %s1040_s23 }
  0xc2   :  { %v253_v6 = vstv %s1357_s0  ;;  %s1090_s30 = sld [smem:[#allocation10 + $0x3d]]  ;;  %v1147_v21 = vmul.f32 %v282_v39, %v905_v42  ;;  %v438_v25 = vstv %s1030_s25  ;;  %v1164_v39 = vmul.f32 %v360_v5, %v905_v42  ;;  %s703_s25 = smov [#allocation14]  }
  0xc3   :  { %v305_v9 = vstv %s1358_s5  ;;  %s1100_s8 = sld [smem:[#allocation10 + $0x3e]]  ;;  %v1103_v29 = vmul.f32 %v253_v6, %v903_v41  ;;  %1362 = vst [vmem:[#allocation40_spill] sm:$0xff] %v1130_v4  ;;  %v386_v6 = vstv %s1012_s20  ;;  %v1170_v4 = vmul.f32 %v412_v7, %v905_v42  ;;  %s477_s6 = sshll.u32 %s703_s25, 4  ;;  %s478_s6 = int_to_ptr.vmem [resolvable:$true] %s477_s6 }
  0xc4   :  { %v1109_v31 = vmul.f32 %v305_v9, %v903_v41  ;;  %s1112_s11 = sld [smem:[#allocation10 + $0x3f]]  ;;  %v1138_v9 = vmul.f32 %v435_v34, %v903_v41  ;;  %v285_v36 = vstv %s1052_s26  ;;  %v1158_v34 = vmul.f32 %v334_v55, %v905_v42  ;;  %1364 = vst [vmem:[#allocation42_spill] sm:$0xff] %v1164_v39  ;;  %s667_s23 = scalar_lea.vmem %s478_s6, 128 }
  0xc5   :  { %s1122_s12 = sld [smem:[#allocation11]]  ;;  %v311_v41 = vstv %s1062_s27  ;;  %1366 = vst [vmem:[#allocation44_spill] sm:$0xff] %v1170_v4  ;;  %v1175_v47 = vmul.f32 %v259_v15, %v918_v49  ;;  %v1180_v57 = vmul.f32 %v438_v25, %v905_v42  ;;  %p668_p2 = scmp.ne.s32.totalorder %s478_s6, %s667_s23 }
  0xc6   :  { %s1132_s4 = sld [smem:[#allocation11 + $0x1]]  ;;  %1363 = vst [vmem:[#allocation41_spill] sm:$0xff] %v1138_v9  ;;  %v337_v40 = vstv %s1072_s28  ;;  %v1167_v9 = vmul.f32 %v386_v6, %v905_v42  ;;  %v1186_v6 = vmul.f32 %v285_v36, %v918_v49  ;;  %v1189_v7 = vmul.f32 %v311_v41, %v918_v49  ;;  %p672_p3 = scmp.lt.s32.totalorder %s478_s6, %s478_s6 }
  0xc7   :  { %s1140_s1 = sld [smem:[#allocation11 + $0x2]]  ;;  %v363_v55 = vstv %s1080_s29  ;;  %1367 = vst [vmem:[#allocation45_spill] sm:$0xff] %v1180_v57  ;;  %v1197_v42 = vmul.f32 %v337_v40, %v918_v49  ;;  %p673_p4 = scmp.lt.s32.totalorder %s667_s23, %s667_s23 }
  0xc8   :  { %s1150_s21 = sld [smem:[#allocation11 + $0x3]]  ;;  %1365 = vst [vmem:[#allocation43_spill] sm:$0xff] %v1167_v9  ;;  %v389_v62 = vstv %s1090_s30  ;;  %1368 = vst [vmem:[#allocation46_spill] sm:$0xff] %v1189_v7  ;;  %v1203_v36 = vmul.f32 %v363_v55, %v918_v49 }
  0xc9   :  { %s1160_s2 = sld [smem:[#allocation11 + $0x4]]  ;;  %v415_v4 = vstv %s1100_s8  ;;  %1369 = vst [vmem:[#allocation47_spill] sm:$0xff] %v1197_v42  ;;  %v1206_v41 = vmul.f32 %v389_v62, %v918_v49  ;;  %p674_p5 = por %p673_p4, %p672_p3 }
  0xca   :  { %s1172_s9 = sld [smem:[#allocation11 + $0x5]]  ;;  %v441_v25 = vstv %s1112_s11  ;;  %v1212_v40 = vmul.f32 %v415_v4, %v918_v49 }
  0xcb   :  { %s1182_s13 = sld [smem:[#allocation11 + $0x6]]  ;;  %v239_v5 = vstv %s1122_s12  ;;  %1370 = vst [vmem:[#allocation48_spill] sm:$0xff] %v1206_v41  ;;  %v1218_v55 = vmul.f32 %v441_v25, %v918_v49  ;;  %p675_p6 = pnand %p674_p5, %p668_p2 }
  0xcc   :  { %s1192_s14 = sld [smem:[#allocation11 + $0x7]]  ;;  %v240_v15 = vadd.f32 %v239_v5, %v911_v45  ;;  %v265_v9 = vstv %s1132_s4 }
  0xcd   :  { %v266_v57 = vadd.f32 %v265_v9, %v921_v51  ;;  %v291_v39 = vstv %s1140_s1  ;;  %s1244_s16 = sld [smem:[#allocation13]] }
  0xce   :  { %v243_v7 = vadd.f32 %v943_v61, %v240_v15  ;;  %v292_v45 = vadd.f32 %v291_v39, %v927_v54  ;;  %v317_v5 = vstv %s1150_s21  ;;  %s1250_s10 = sld [smem:[#allocation13 + $0x1]] }
  0xcf   :  { %v269_v42 = vadd.f32 %v951_v1, %v266_v57  ;;  %v318_v51 = vadd.f32 %v317_v5, %v930_v56  ;;  %v343_v9 = vstv %s1160_s2  ;;  %s1256_s15 = sld [smem:[#allocation13 + $0x2]]  ;;  %v1375_v5 = vld [vmem:[#allocation40_spill] sm:$0xff] }
  0xd0   :  { %v246_v62 = vadd.f32 %v983_v17, %v243_v7  ;;  %v295_v41 = vadd.f32 %v953_v2, %v292_v45  ;;  %v344_v61 = vadd.f32 %v343_v9, %v935_v58  ;;  %v369_v54 = vstv %s1172_s9  ;;  %s1262_s17 = sld [smem:[#allocation13 + $0x3]]  ;;  %v1374_v45 = vld [vmem:[#allocation42_spill] sm:$0xff] }
  0xd1   :  { %v272_v39 = vadd.f32 %v986_v18, %v269_v42  ;;  %v321_v4 = vadd.f32 %v962_v8, %v318_v51  ;;  %v370_v1 = vadd.f32 %v369_v54, %v937_v59  ;;  %v395_v57 = vstv %s1182_s13  ;;  %s1268_s18 = sld [smem:[#allocation13 + $0x4]]  ;;  %v1376_v51 = vld [vmem:[#allocation47_spill] sm:$0xff] }
  0xd2   :  { %v249_v56 = vadd.f32 %v1023_v33, %v246_v62  ;;  %v298_v49 = vadd.f32 %v989_v19, %v295_v41  ;;  %v347_v15 = vadd.f32 %v967_v10, %v344_v61  ;;  %v396_v17 = vadd.f32 %v395_v57, %v939_v60  ;;  %s1278_s19 = sld [smem:[#allocation13 + $0x5]]  ;;  %v1373_v41 = vld [vmem:[#allocation46_spill] sm:$0xff] }
  0xd3   :  { %v275_v2 = vadd.f32 %v1027_v35, %v272_v39  ;;  %v324_v58 = vadd.f32 %v997_v23, %v321_v4  ;;  %v373_v7 = vadd.f32 %v970_v12, %v370_v1  ;;  %v421_v18 = vstv %s1192_s14  ;;  %v1378_v62 = vld [vmem:[#allocation38_spill] sm:$0xff]  ;;  %s1286_s24 = sld [smem:[#allocation13 + $0x6]]  ;;  %v1379_v4 = vld [vmem:[#allocation44_spill] sm:$0xff] }
  0xd4   :  { %v252_v8 = vadd.f32 %v1055_v53, %v249_v56  ;;  %v301_v59 = vadd.f32 %v1034_v44, %v298_v49  ;;  %v350_v42 = vadd.f32 %v1000_v24, %v347_v15  ;;  %v399_v33 = vadd.f32 %v975_v14, %v396_v17  ;;  %v1380_v49 = vld [vmem:[#allocation48_spill] sm:$0xff]  ;;  %v1381_v17 = vld [vmem:[#allocation41_spill] sm:$0xff]  ;;  %s579_s7 = sld [smem:[#allocation13 + $0x7]] }
  0xd5   :  { %v278_v19 = vadd.f32 %v1065_v63, %v275_v2  ;;  %v327_v10 = vadd.f32 %v1038_v46, %v324_v58  ;;  %v376_v60 = vadd.f32 %v1007_v27, %v373_v7  ;;  %v422_v35 = vadd.f32 %v421_v18, %v947_v0  ;;  %s1383_s22 = sld [smem:[#allocation49_spill]] }
  0xd6   :  { %v255_v12 = vadd.f32 %v1103_v29, %v252_v8  ;;  %v304_v23 = vadd.f32 %v1068_v3, %v301_v59  ;;  %v353_v44 = vadd.f32 %v1044_v48, %v350_v42  ;;  %v402_v24 = vadd.f32 %v1010_v28, %v399_v33 }
  0xd7   :  { %v281_v14 = vadd.f32 %v1106_v30, %v278_v19  ;;  %v330_v46 = vadd.f32 %v1078_v38, %v327_v10  ;;  %v379_v27 = vadd.f32 %v1047_v50, %v376_v60  ;;  %v425_v0 = vadd.f32 %v978_v16, %v422_v35 }
  0xd8   :  { %v258_v53 = vadd.f32 %v1143_v11, %v255_v12  ;;  %v307_v63 = vadd.f32 %v1109_v31, %v304_v23  ;;  %v356_v48 = vadd.f32 %v1084_v13, %v353_v44  ;;  %v405_v28 = vadd.f32 %v1050_v52, %v402_v24 }
  0xd9   :  { %v284_v3 = vadd.f32 %v1147_v21, %v281_v14  ;;  %v333_v38 = vadd.f32 %v1117_v43, %v330_v46  ;;  %v382_v50 = vadd.f32 %v1088_v20, %v379_v27  ;;  %v428_v16 = vadd.f32 %v1018_v32, %v425_v0  ;;  %v1371_v21 = vld [vmem:[#allocation39_spill] sm:$0xff]  ;;  %v1372_v20 = vld [vmem:[#allocation37_spill] sm:$0xff] }
  0xda   :  { %v261_v29 = vadd.f32 %v1175_v47, %v258_v53  ;;  %v310_v30 = vadd.f32 %v1154_v26, %v307_v63  ;;  %v359_v13 = vadd.f32 %v1120_v37, %v356_v48  ;;  %v408_v52 = vadd.f32 %v1094_v22, %v405_v28 }
  0xdb   :  { %v287_v31 = vadd.f32 %v1186_v6, %v284_v3  ;;  %v336_v11 = vadd.f32 %v1158_v34, %v333_v38  ;;  %v385_v43 = vadd.f32 %v1371_v21, %v382_v50  ;;  %v431_v25 = vadd.f32 %v1372_v20, %v428_v16  ;;  %v1377_v34 = vld [vmem:[#allocation43_spill] sm:$0xff] }
  0xdc   :  { %v262_v32 = vmax.f32 %v261_v29, 0.0  ;;  %v313_v47 = vadd.f32 %v1373_v41, %v310_v30  ;;  %v362_v26 = vadd.f32 %v1374_v45, %v359_v13  ;;  %v411_v37 = vadd.f32 %v1375_v5, %v408_v52 }
  0xdd   :  { %v288_v22 = vmax.f32 %v287_v31, 0.0  ;;  %v339_v6 = vadd.f32 %v1376_v51, %v336_v11  ;;  %v388_v9 = vadd.f32 %v1377_v34, %v385_v43  ;;  %v434_v61 = vadd.f32 %v1378_v62, %v431_v25 }
  0xde   :  { %v314_v54 = vmax.f32 %v313_v47, 0.0  ;;  %v365_v39 = vadd.f32 %v1203_v36, %v362_v26  ;;  %v414_v1 = vadd.f32 %v1379_v4, %v411_v37  ;;  %v445_v57 = vstv %s1244_s16  ;;  %v1382_v36 = vld [vmem:[#allocation45_spill] sm:$0xff] }
  0xdf   :  { %v340_v56 = vmax.f32 %v339_v6, 0.0  ;;  %v391_v15 = vadd.f32 %v1380_v49, %v388_v9  ;;  %v437_v2 = vadd.f32 %v1381_v17, %v434_v61  ;;  %v446_v58 = vmul.f32 %v445_v57, %v262_v32 }
  0xe0   :  { %v366_v7 = vmax.f32 %v365_v39, 0.0  ;;  %v449_v18 = vstv %s1250_s10  ;;  %v452_v8 = vstv %s1256_s15  ;;  %v417_v59 = vadd.f32 %v1212_v40, %v414_v1 }
  0xe1   :  { %v440_v42 = vadd.f32 %v1382_v36, %v437_v2  ;;  %v1384_v33 = vstv %s1383_s22  ;;  %v450_v10 = vmul.f32 %v449_v18, %v288_v22  ;;  %v453_v60 = vmul.f32 %v452_v8, %v314_v54 }
  0xe2   :  { %v448_v19 = vadd.f32 %v1384_v33, %v446_v58  ;;  %v455_v35 = vstv %s1262_s17  ;;  %v458_v12 = vstv %s1268_s18  ;;  %v392_v23 = vmax.f32 %v391_v15, 0.0 }
  0xe3   :  { %v443_v44 = vadd.f32 %v1218_v55, %v440_v42  ;;  %v456_v14 = vmul.f32 %v455_v35, %v340_v56  ;;  %v461_v46 = vstv %s1278_s19  ;;  %v418_v27 = vmax.f32 %v417_v59, 0.0 }
  0xe4   :  { %v451_v24 = vadd.f32 %v450_v10, %v448_v19  ;;  %v459_v40 = vmul.f32 %v458_v12, %v366_v7  ;;  %v464_v53 = vstv %s1286_s24  ;;  %v462_v28 = vmul.f32 %v461_v46, %v392_v23 }
  0xe5   :  { %v444_v63 = vmax.f32 %v443_v44, 0.0  ;;  %v467_v3 = vstv %s579_s7  ;;  %v465_v50 = vmul.f32 %v464_v53, %v418_v27 }
  0xe6   :  { %v454_v0 = vadd.f32 %v453_v60, %v451_v24 }
  0xe7   :  { %v468_v29 = vmul.f32 %v467_v3, %v444_v63 }
  0xe8   :  { %v457_v48 = vadd.f32 %v456_v14, %v454_v0 }
  0xea   :  { %v460_v38 = vadd.f32 %v459_v40, %v457_v48 }
  0xec   :  { %v463_v16 = vadd.f32 %v462_v28, %v460_v38 }
  0xee   :  { %v466_v30 = vadd.f32 %v465_v50, %v463_v16 }
  0xf0   :  { %v469_v13 = vadd.f32 %v468_v29, %v466_v30 }
  0xf2   :  { %470 = vst [vmem:[#allocation14] sm:$0xff] %v469_v13 }
  0xf3   :  { %678 = shalt.err (!%p675_p6)
}
  0xf4   :  { %s1385_s26 = sld [smem:[#allocation50_spill]] }
  0xfa   :  { %480 = dma.vmem_to_hbm [thread:$0]  %s478_s6, 128, %s1385_s26, [#allocation5]  }
  0xfb   :  { %695 = dma.done.wait [#allocation5], 128  }
  0xfc   :  { %696 = vsyncadd [#allocation5], 4294967168 }
  0xfd   :  { %484 = vsyncpa [#allocation4], 1 }
  0xfe   :  { %485 = vsyncpa [#allocation5], 1 }
  0xff   :  { %486 = vsyncpa [#allocation6], 1 }
 0x100   :  { %487 = vsyncpa [#allocation9], 1 }
 0x101   :  { %488 = vsyncpa [#allocation12], 1 }

</bundles_post_ra>
